<compile_context>
chip_gen: v5e
topology: v5e:2x2
jax: 0.10.0
libtpu: 0.0.40
codegen_flags: <defaults>
</compile_context>

<pallas_src>
import functools

import jax
import jax.numpy as jnp
import numpy as np
from jax import lax
from jax.experimental import pallas as pl
from jax.experimental.pallas import tpu as pltpu


def _sgpn_loss_kernel(fsim_ref, trow_ref, out_ref, *, alpha, bb, n):
    """One grid step: `bb` batch elements, emits [pos_sum, neg_sum] partials.

    fsim_ref : (bb, C, N) f32   features (NCW layout)
    trow_ref : (bb, 1, N) f32   group labels as floats, row orientation
    out_ref  : (1, 8, 128) f32  lane 0 = sum(pos), lane 1 = sum(neg)
    """

    def body(bi, carry):
        pos_acc, neg_acc = carry

        f = fsim_ref[bi]          # (C, N)
        t = trow_ref[bi]          # (1, N)

        # Gram matrix on the MXU: g[i, j] = <f[:, i], f[:, j]>
        g = lax.dot_general(f, f, (((0,), (0,)), ((), ())),
                            preferred_element_type=jnp.float32)      # (N, N)

        # Squared norms per point: row orientation from a sublane reduce,
        # column orientation via one XLU transpose of the broadcast plane
        # (no extra MXU pass, no lane-width-1 intermediates).
        r_row = jnp.sum(f * f, axis=0, keepdims=True)                # (1, N)
        r_col = jnp.transpose(jnp.broadcast_to(r_row, (n, n)))       # (N, N)

        # D[i, j] = ||f_i - f_j||^2, clamped at 0.
        D = jnp.maximum(r_row + r_col - 2.0 * g, 0.0)                # (N, N)

        # Same-group matrix from label equality (diagonal is exactly 1).
        t_col = jnp.transpose(jnp.broadcast_to(t, (n, n)))           # (N, N)
        S = jnp.where(t_col == t, 1.0, 0.0)                          # (N, N)

        pos = S * D
        neg = alpha * ((1.0 - S) * pl.reciprocal(D + 1.0, approx=True))

        return pos_acc + jnp.sum(pos), neg_acc + jnp.sum(neg)

    pos_sum, neg_sum = lax.fori_loop(
        0, bb, body, (jnp.float32(0.0), jnp.float32(0.0)), unroll=True)

    # Single lane-dense output block: lane 0 = pos_sum, lane 1 = neg_sum.
    lane = lax.broadcasted_iota(jnp.int32, (1, 8, 128), 2)
    out_ref[...] = (jnp.where(lane == 0, pos_sum, 0.0)
                    + jnp.where(lane == 1, neg_sum, 0.0))


def sgpn_loss(l0_points, Fsim, conf, target, alpha=2.0, margin=0.8,
              num_groups=16):
    """Pallas implementation of SGPNLoss.forward.

    Returns (loss_mean, pos_mean, neg_mean). `margin`, `conf` and the point
    coordinates are unused by the PyTorch forward (l0_points only supplies B).
    """
    del l0_points, conf, margin, num_groups
    B, C, N = Fsim.shape

    # Block several batch elements per grid step (amortize per-step overhead).
    bb = 1
    for cand in (8, 4, 2, 1):
        if B % cand == 0:
            bb = cand
            break
    grid = B // bb

    # Labels as float rows; equality on small integers stored in f32 is exact.
    # NOTE: assumes valid labels (two identical out-of-range labels would get
    # S = 1 off-diagonal, matching the int semantics but not one_hot's).
    t_row = target.astype(jnp.float32).reshape(B, 1, N)

    # Keep the Gram inputs in f32: bf16 feed would halve HBM traffic on
    # v6e/v7x but risks the r - 2g cancellation exceeding tolerance.
    fsim_f32 = Fsim.astype(jnp.float32)

    kernel = functools.partial(_sgpn_loss_kernel,
                               alpha=float(alpha), bb=bb, n=N)

    partial_sums = pl.pallas_call(
        kernel,
        out_shape=jax.ShapeDtypeStruct((grid, 8, 128), jnp.float32),
        grid_spec=pltpu.PrefetchScalarGridSpec(
            num_scalar_prefetch=0,
            grid=(grid,),
            in_specs=[
                pl.BlockSpec((bb, C, N), lambda i: (i, 0, 0)),
                pl.BlockSpec((bb, 1, N), lambda i: (i, 0, 0)),
            ],
            out_specs=pl.BlockSpec((1, 8, 128), lambda i: (i, 0, 0)),
        ),
        compiler_params=pltpu.CompilerParams(
            dimension_semantics=("parallel",)),
    )(fsim_f32, t_row)

    sums = jnp.sum(partial_sums[:, 0, :], axis=0)   # (128,)
    denom = float(B * N * N)
    pos_mean = sums[0] / denom
    neg_mean = sums[1] / denom
    # group_mask weight is all-ones, so the weighted total is pos + neg.
    loss = pos_mean + neg_mean
    return loss, pos_mean, neg_mean


def _reference(Fsim, target, num_groups, alpha=2.0):
    """Plain-JAX transcription of the PyTorch forward, for validation."""
    B, C, N = Fsim.shape
    r = jnp.sum(Fsim * Fsim, axis=1).reshape(B, 1, N)
    trans = jnp.transpose(Fsim, (0, 2, 1))
    mul = 2.0 * jnp.matmul(trans, Fsim)
    D = r - mul + jnp.transpose(r, (0, 2, 1))
    D = jnp.where(D <= 0.0, 0.0, D)
    L = jax.nn.one_hot(target, num_groups, dtype=jnp.float32)
    S = jnp.matmul(L, jnp.transpose(L, (0, 2, 1)))
    eye = jnp.eye(N, dtype=jnp.float32)[None]
    S = S * (1.0 - eye) + eye
    pos = S * D
    neg = alpha * (1.0 - S) * (1.0 / (D + 1.0))
    gm = jnp.ones((B, N), jnp.float32)
    w = gm[:, :, None] * gm[:, None, :]
    sl = (neg + pos) * w
    return jnp.mean(sl), jnp.mean(pos), jnp.mean(neg)


if __name__ == "__main__":
    key = jax.random.PRNGKey(0)
    B, C, N, NG = 2, 32, 128, 16
    k1, k2, k3, k4 = jax.random.split(key, 4)

    l0_points = jax.random.normal(k1, (B, 3, N), dtype=jnp.float32)
    Fsim = jax.random.normal(k2, (B, C, N), dtype=jnp.float32)
    conf = jax.random.uniform(k3, (B, N, 1), dtype=jnp.float32)
    target = jax.random.randint(k4, (B, N), 0, NG)

    loss, pos_m, neg_m = sgpn_loss(l0_points, Fsim, conf, target,
                                   alpha=2.0, margin=0.8, num_groups=NG)
    jax.block_until_ready(loss)

    ref_loss, ref_pos, ref_neg = _reference(Fsim, target, NG, alpha=2.0)
    np.testing.assert_allclose(np.asarray(loss), np.asarray(ref_loss),
                               rtol=2e-3, atol=2e-3)
    np.testing.assert_allclose(np.asarray(pos_m), np.asarray(ref_pos),
                               rtol=2e-3, atol=2e-3)
    np.testing.assert_allclose(np.asarray(neg_m), np.asarray(ref_neg),
                               rtol=2e-3, atol=2e-3)

    print("KERNEL_OK")
</pallas_src>

<mosaic_0001>
module attributes {stable_mosaic.version = 11 : i64} {
  func.func @_sgpn_loss_kernel(%arg0: i32, %arg1: memref<2x32x128xf32, #tpu.memory_space<vmem>>, %arg2: memref<2x1x128xf32, #tpu.memory_space<vmem>>, %arg3: memref<1x8x128xf32, #tpu.memory_space<vmem>>) attributes {dimension_semantics = [#tpu.dimension_semantics<parallel>], iteration_bounds = array<i64: 1>, scalar_prefetch = 0 : i64, scratch_operands = 0 : i64, tpu.core_type = #tpu.core_type<tc>, window_params = [{transform_indices = @transform_0, window_bounds = array<i64: 2, 32, 128>}, {transform_indices = @transform_1, window_bounds = array<i64: 2, 1, 128>}, {transform_indices = @transform_2, window_bounds = array<i64: 1, 8, 128>}]} {
    %cst = arith.constant 0.000000e+00 : f32
    %cst_0 = arith.constant 0.000000e+00 : f32
    %c0_i32 = arith.constant 0 : i32
    %0 = arith.index_cast %c0_i32 : i32 to index
    %c0 = arith.constant 0 : index
    %c0_1 = arith.constant 0 : index
    %1 = vector.load %arg1[%0, %c0, %c0_1] : memref<2x32x128xf32, #tpu.memory_space<vmem>>, vector<1x32x128xf32>
    %2 = vector.shape_cast %1 : vector<1x32x128xf32> to vector<32x128xf32>
    %3 = arith.index_cast %c0_i32 : i32 to index
    %c0_2 = arith.constant 0 : index
    %c0_3 = arith.constant 0 : index
    %4 = vector.load %arg2[%3, %c0_2, %c0_3] : memref<2x1x128xf32, #tpu.memory_space<vmem>>, vector<1x1x128xf32>
    %5 = vector.shape_cast %4 : vector<1x1x128xf32> to vector<1x128xf32>
    %cst_4 = arith.constant dense<0.000000e+00> : vector<128x128xf32>
    %6 = tpu.matmul %2, %2, %cst_4 {dimension_numbers = #tpu.dot_dimension_numbers<[0], [0], [1], [1], [0, 1, 1, 1], [], []>} : vector<32x128xf32>, vector<32x128xf32>, vector<128x128xf32> -> vector<128x128xf32>
    %7 = arith.mulf %2, %2 : vector<32x128xf32>
    %cst_5 = arith.constant dense<0.000000e+00> : vector<128xf32>
    %8 = vector.multi_reduction <add>, %7, %cst_5 [0] : vector<32x128xf32> to vector<128xf32>
    %9 = vector.shape_cast %8 : vector<128xf32> to vector<1x128xf32>
    %10 = vector.shape_cast %9 : vector<1x128xf32> to vector<1x128xf32>
    %11 = vector.broadcast %10 : vector<1x128xf32> to vector<128x128xf32>
    %12 = tpu.transpose %11, [1, 0] : vector<128x128xf32> -> vector<128x128xf32>
    %13 = vector.broadcast %9 : vector<1x128xf32> to vector<128x128xf32>
    %14 = arith.addf %13, %12 : vector<128x128xf32>
    %cst_6 = arith.constant 2.000000e+00 : f32
    %15 = vector.broadcast %cst_6 : f32 to vector<128x128xf32>
    %16 = arith.mulf %15, %6 : vector<128x128xf32>
    %17 = arith.subf %14, %16 : vector<128x128xf32>
    %cst_7 = arith.constant 0.000000e+00 : f32
    %18 = vector.broadcast %cst_7 : f32 to vector<128x128xf32>
    %19 = arith.maximumf %17, %18 : vector<128x128xf32>
    %20 = vector.shape_cast %5 : vector<1x128xf32> to vector<1x128xf32>
    %21 = vector.broadcast %20 : vector<1x128xf32> to vector<128x128xf32>
    %22 = tpu.transpose %21, [1, 0] : vector<128x128xf32> -> vector<128x128xf32>
    %23 = vector.broadcast %5 : vector<1x128xf32> to vector<128x128xf32>
    %24 = arith.cmpf oeq, %22, %23 : vector<128x128xf32>
    %cst_8 = arith.constant 1.000000e+00 : f32
    %cst_9 = arith.constant 0.000000e+00 : f32
    %25 = vector.broadcast %cst_8 : f32 to vector<128x128xf32>
    %26 = vector.broadcast %cst_9 : f32 to vector<128x128xf32>
    %27 = arith.select %24, %25, %26 : vector<128x128xi1>, vector<128x128xf32>
    %28 = arith.mulf %27, %19 : vector<128x128xf32>
    %cst_10 = arith.constant 1.000000e+00 : f32
    %29 = vector.broadcast %cst_10 : f32 to vector<128x128xf32>
    %30 = arith.subf %29, %27 : vector<128x128xf32>
    %cst_11 = arith.constant 1.000000e+00 : f32
    %31 = vector.broadcast %cst_11 : f32 to vector<128x128xf32>
    %32 = arith.addf %19, %31 : vector<128x128xf32>
    %33 = tpu.reciprocal %32 {approx = true} : vector<128x128xf32> -> vector<128x128xf32>
    %34 = arith.mulf %30, %33 : vector<128x128xf32>
    %cst_12 = arith.constant 2.000000e+00 : f32
    %35 = vector.broadcast %cst_12 : f32 to vector<128x128xf32>
    %36 = arith.mulf %35, %34 : vector<128x128xf32>
    %37 = vector.shape_cast %28 : vector<128x128xf32> to vector<1x128x128xf32>
    %cst_13 = arith.constant dense<0.000000e+00> : vector<1xf32>
    %38 = vector.multi_reduction <add>, %37, %cst_13 [1, 2] : vector<1x128x128xf32> to vector<1xf32>
    %39 = vector.shape_cast %38 : vector<1xf32> to vector<1x1x1xf32>
    %40 = vector.extract %39[0, 0, 0] : f32 from vector<1x1x1xf32>
    %41 = arith.addf %cst, %40 : f32
    %42 = vector.shape_cast %36 : vector<128x128xf32> to vector<1x128x128xf32>
    %cst_14 = arith.constant dense<0.000000e+00> : vector<1xf32>
    %43 = vector.multi_reduction <add>, %42, %cst_14 [1, 2] : vector<1x128x128xf32> to vector<1xf32>
    %44 = vector.shape_cast %43 : vector<1xf32> to vector<1x1x1xf32>
    %45 = vector.extract %44[0, 0, 0] : f32 from vector<1x1x1xf32>
    %46 = arith.addf %cst_0, %45 : f32
    %c1_i32 = arith.constant 1 : i32
    %47 = arith.index_cast %c1_i32 : i32 to index
    %c0_15 = arith.constant 0 : index
    %c0_16 = arith.constant 0 : index
    %48 = vector.load %arg1[%47, %c0_15, %c0_16] : memref<2x32x128xf32, #tpu.memory_space<vmem>>, vector<1x32x128xf32>
    %49 = vector.shape_cast %48 : vector<1x32x128xf32> to vector<32x128xf32>
    %50 = arith.index_cast %c1_i32 : i32 to index
    %c0_17 = arith.constant 0 : index
    %c0_18 = arith.constant 0 : index
    %51 = vector.load %arg2[%50, %c0_17, %c0_18] : memref<2x1x128xf32, #tpu.memory_space<vmem>>, vector<1x1x128xf32>
    %52 = vector.shape_cast %51 : vector<1x1x128xf32> to vector<1x128xf32>
    %cst_19 = arith.constant dense<0.000000e+00> : vector<128x128xf32>
    %53 = tpu.matmul %49, %49, %cst_19 {dimension_numbers = #tpu.dot_dimension_numbers<[0], [0], [1], [1], [0, 1, 1, 1], [], []>} : vector<32x128xf32>, vector<32x128xf32>, vector<128x128xf32> -> vector<128x128xf32>
    %54 = arith.mulf %49, %49 : vector<32x128xf32>
    %cst_20 = arith.constant dense<0.000000e+00> : vector<128xf32>
    %55 = vector.multi_reduction <add>, %54, %cst_20 [0] : vector<32x128xf32> to vector<128xf32>
    %56 = vector.shape_cast %55 : vector<128xf32> to vector<1x128xf32>
    %57 = vector.shape_cast %56 : vector<1x128xf32> to vector<1x128xf32>
    %58 = vector.broadcast %57 : vector<1x128xf32> to vector<128x128xf32>
    %59 = tpu.transpose %58, [1, 0] : vector<128x128xf32> -> vector<128x128xf32>
    %60 = vector.broadcast %56 : vector<1x128xf32> to vector<128x128xf32>
    %61 = arith.addf %60, %59 : vector<128x128xf32>
    %cst_21 = arith.constant 2.000000e+00 : f32
    %62 = vector.broadcast %cst_21 : f32 to vector<128x128xf32>
    %63 = arith.mulf %62, %53 : vector<128x128xf32>
    %64 = arith.subf %61, %63 : vector<128x128xf32>
    %cst_22 = arith.constant 0.000000e+00 : f32
    %65 = vector.broadcast %cst_22 : f32 to vector<128x128xf32>
    %66 = arith.maximumf %64, %65 : vector<128x128xf32>
    %67 = vector.shape_cast %52 : vector<1x128xf32> to vector<1x128xf32>
    %68 = vector.broadcast %67 : vector<1x128xf32> to vector<128x128xf32>
    %69 = tpu.transpose %68, [1, 0] : vector<128x128xf32> -> vector<128x128xf32>
    %70 = vector.broadcast %52 : vector<1x128xf32> to vector<128x128xf32>
    %71 = arith.cmpf oeq, %69, %70 : vector<128x128xf32>
    %cst_23 = arith.constant 1.000000e+00 : f32
    %cst_24 = arith.constant 0.000000e+00 : f32
    %72 = vector.broadcast %cst_23 : f32 to vector<128x128xf32>
    %73 = vector.broadcast %cst_24 : f32 to vector<128x128xf32>
    %74 = arith.select %71, %72, %73 : vector<128x128xi1>, vector<128x128xf32>
    %75 = arith.mulf %74, %66 : vector<128x128xf32>
    %cst_25 = arith.constant 1.000000e+00 : f32
    %76 = vector.broadcast %cst_25 : f32 to vector<128x128xf32>
    %77 = arith.subf %76, %74 : vector<128x128xf32>
    %cst_26 = arith.constant 1.000000e+00 : f32
    %78 = vector.broadcast %cst_26 : f32 to vector<128x128xf32>
    %79 = arith.addf %66, %78 : vector<128x128xf32>
    %80 = tpu.reciprocal %79 {approx = true} : vector<128x128xf32> -> vector<128x128xf32>
    %81 = arith.mulf %77, %80 : vector<128x128xf32>
    %cst_27 = arith.constant 2.000000e+00 : f32
    %82 = vector.broadcast %cst_27 : f32 to vector<128x128xf32>
    %83 = arith.mulf %82, %81 : vector<128x128xf32>
    %84 = vector.shape_cast %75 : vector<128x128xf32> to vector<1x128x128xf32>
    %cst_28 = arith.constant dense<0.000000e+00> : vector<1xf32>
    %85 = vector.multi_reduction <add>, %84, %cst_28 [1, 2] : vector<1x128x128xf32> to vector<1xf32>
    %86 = vector.shape_cast %85 : vector<1xf32> to vector<1x1x1xf32>
    %87 = vector.extract %86[0, 0, 0] : f32 from vector<1x1x1xf32>
    %88 = arith.addf %41, %87 : f32
    %89 = vector.shape_cast %83 : vector<128x128xf32> to vector<1x128x128xf32>
    %cst_29 = arith.constant dense<0.000000e+00> : vector<1xf32>
    %90 = vector.multi_reduction <add>, %89, %cst_29 [1, 2] : vector<1x128x128xf32> to vector<1xf32>
    %91 = vector.shape_cast %90 : vector<1xf32> to vector<1x1x1xf32>
    %92 = vector.extract %91[0, 0, 0] : f32 from vector<1x1x1xf32>
    %93 = arith.addf %46, %92 : f32
    %c2_i32 = arith.constant 2 : i32
    %94 = tpu.iota {dimensions = array<i32: 2>} : vector<1x8x128xi32>
    %c0_i32_30 = arith.constant 0 : i32
    %95 = vector.broadcast %c0_i32_30 : i32 to vector<1x8x128xi32>
    %96 = arith.cmpi eq, %94, %95 : vector<1x8x128xi32>
    %cst_31 = arith.constant 0.000000e+00 : f32
    %97 = vector.broadcast %88 : f32 to vector<1x8x128xf32>
    %98 = vector.broadcast %cst_31 : f32 to vector<1x8x128xf32>
    %99 = arith.select %96, %97, %98 : vector<1x8x128xi1>, vector<1x8x128xf32>
    %c1_i32_32 = arith.constant 1 : i32
    %100 = vector.broadcast %c1_i32_32 : i32 to vector<1x8x128xi32>
    %101 = arith.cmpi eq, %94, %100 : vector<1x8x128xi32>
    %cst_33 = arith.constant 0.000000e+00 : f32
    %102 = vector.broadcast %93 : f32 to vector<1x8x128xf32>
    %103 = vector.broadcast %cst_33 : f32 to vector<1x8x128xf32>
    %104 = arith.select %101, %102, %103 : vector<1x8x128xi1>, vector<1x8x128xf32>
    %105 = arith.addf %99, %104 : vector<1x8x128xf32>
    %c0_34 = arith.constant 0 : index
    %c0_35 = arith.constant 0 : index
    %c0_36 = arith.constant 0 : index
    %106 = vector.load %arg3[%c0_34, %c0_35, %c0_36] : memref<1x8x128xf32, #tpu.memory_space<vmem>>, vector<1x8x128xf32>
    tpu.vector_store %arg3[%c0_34, %c0_35, %c0_36], %105 {strides = array<i32>} : memref<1x8x128xf32, #tpu.memory_space<vmem>>, vector<1x8x128xf32>,
    return
  }
  func.func @transform_0(%arg0: i32) -> (i32, i32, i32) {
    %c0_i32 = arith.constant 0 : i32
    %c0_i32_0 = arith.constant 0 : i32
    %c0_i32_1 = arith.constant 0 : i32
    return %arg0, %c0_i32, %c0_i32_0 : i32, i32, i32
  }
  func.func @transform_1(%arg0: i32) -> (i32, i32, i32) {
    %c0_i32 = arith.constant 0 : i32
    %c0_i32_0 = arith.constant 0 : i32
    %c0_i32_1 = arith.constant 0 : i32
    return %arg0, %c0_i32, %c0_i32_0 : i32, i32, i32
  }
  func.func @transform_2(%arg0: i32) -> (i32, i32, i32) {
    %c0_i32 = arith.constant 0 : i32
    %c0_i32_0 = arith.constant 0 : i32
    %c0_i32_1 = arith.constant 0 : i32
    return %arg0, %c0_i32, %c0_i32_0 : i32, i32, i32
  }
}

</mosaic_0001>

<bundles_post_ra>
// kernel: tpu_custom_call.1
= control target key start
LH: loop header
LB: loop body
LE: loop exit
PB: predicated region body
PF: predicated region fallthrough
CT: control target
= control target key end

     0   :  { %7 = vsyncpa [#allocation3], 0  ;;  %s1653_s0 = inlined_call_operand.hbm [shape: f32[2,32,128], index: 0, kind: input, shape index: {}]   ;;  %s1654_s1 = inlined_call_operand.hbm [shape: f32[2,1,128], index: 1, kind: input, shape index: {}]   ;;  %s1655_s2 = inlined_call_operand.hbm [shape: f32[1,8,128], index: 2, kind: output, shape index: {}]  }
   0x1   :  { %8 = vsyncpa [#allocation6], 0 }
   0x2   :  { %9 = vsyncpa [#allocation4], 0  ;;  %s14_s11 = sshll.u32 %s1653_s0, 4  ;;  %s1221_s12 = smov [#allocation2]   ;;  %s15_s11 = int_to_ptr.hbm [resolvable:$true] %s14_s11 }
   0x3   :  { %s16_s13 = sshll.u32 %s1221_s12, 4  ;;  %s27_s16 = sshll.u32 %s1654_s1, 4  ;;  %s17_s13 = int_to_ptr.vmem [resolvable:$true] %s16_s13  ;;  %s28_s16 = int_to_ptr.hbm [resolvable:$true] %s27_s16 }
   0x4   :  { %s1222_s17 = smov 128   ;;  %s1223_s18 = smov 8  }
   0x5   :  { %22 = dma.hbm_to_vmem [thread:$0]  %s15_s11, 1024, %s17_s13, [#allocation3], %s1222_s17, %s1222_s17, %s1223_s18  }
   0x6   :  { %s1224_s19 = smov [#allocation5]   ;;  %s1225_s21 = smov 16  }
   0x7   :  { %s29_s20 = sshll.u32 %s1224_s19, 4  ;;  %s1226_s22 = smov 1   ;;  %s30_s20 = int_to_ptr.vmem [resolvable:$true] %s29_s20 }
   0x8   :  { %35 = dma.hbm_to_vmem [thread:$0]  %s28_s16, 32, %s30_s20, [#allocation6], %s1225_s21, %s1225_s21, %s1226_s22  }
   0x9   :  { %1215 = dma.done.wait [#allocation3], 1024  }
   0xa   :  { %1216 = vsyncadd [#allocation3], 4294966272 }
   0xb   :  { %1217 = dma.done.wait [#allocation6], 32  }
   0xc   :  { %1218 = vsyncadd [#allocation6], 4294967264  ;;  %v44_v0 = vld [vmem:[#allocation2] sm:$0xff]  ;;  %v45_v1 = vld [vmem:[#allocation2 + $0x8] sm:$0xff]  ;;  %vm81_vm0 = vcmask 261120   ;;  %s1228_s27 = smov [#allocation7]  }
   0xd   :  { %49 = vxpose.xlu0.b32.start [1/4] (short) %v44_v0, 128  ;;  %v195_v2 = vmul.f32 %v44_v0, %v44_v0  ;;  %v196_v3 = vmul.f32 %v45_v1, %v45_v1  ;;  %v518_v4 = vld [vmem:[#allocation2 + $0x20] sm:$0xff]  ;;  %v46_v5 = vld [vmem:[#allocation2 + $0x10] sm:$0xff]  ;;  %v47_v6 = vld [vmem:[#allocation2 + $0x18] sm:$0xff]  ;;  %s1006_s28 = sshll.u32 %s1228_s27, 4  ;;  %s1008_s3 = sshll.u32 %s1655_s2, 4  ;;  %s1007_s28 = int_to_ptr.vmem [resolvable:$true] %s1006_s28  ;;  %s1009_s3 = int_to_ptr.hbm [resolvable:$true] %s1008_s3 }
   0xe   :  { %524 = vxpose.xlu2.b32.start [1/4] (short) %v518_v4, 128  ;;  %v669_v7 = vmul.f32 %v518_v4, %v518_v4  ;;  %v197_v8 = vmul.f32 %v46_v5, %v46_v5  ;;  %v519_v9 = vld [vmem:[#allocation2 + $0x28] sm:$0xff]  ;;  %v520_v10 = vld [vmem:[#allocation2 + $0x30] sm:$0xff]  ;;  %142 = vmatpush.msra.mxu0 %v47_v6  ;;  %v198_v12 = vmul.f32 %v47_v6, %v47_v6  ;;  %v521_v17 = vld [vmem:[#allocation2 + $0x38] sm:$0xff] }
   0xf   :  { %v199_v11 = vadd.f32 %v196_v3, %v195_v2  ;;  %v670_v13 = vmul.f32 %v519_v9, %v519_v9  ;;  %v671_v14 = vmul.f32 %v520_v10, %v520_v10  ;;  %1051 = vmatpush.msra.mxu2 %v47_v6  ;;  %v672_v18 = vmul.f32 %v521_v17, %v521_v17  ;;  %v1265_v33 = vld [vmem:[#allocation5] ss:$0 sm:$0xff]  ;;  %v1276_v35 = vld [vmem:[#allocation5 + $0x1] ss:$0 sm:$0xff] }
  0x10   :  { %143 = vmatpush.msra.mxu0 %v46_v5  ;;  %616 = vmatpush.msra.mxu1 %v521_v17 }
  0x11   :  { %v200_v15 = vadd.f32 %v199_v11, %v197_v8  ;;  %v673_v16 = vadd.f32 %v670_v13, %v669_v7  ;;  %1052 = vmatpush.msra.mxu2 %v46_v5  ;;  %1055 = vmatpush.msra.mxu3 %v521_v17 }
  0x12   :  { %144 = vmatpush.msra.mxu0 %v45_v1  ;;  %617 = vmatpush.msra.mxu1 %v520_v10 }
  0x13   :  { %v201_v19 = vadd.f32 %v200_v15, %v198_v12  ;;  %v674_v20 = vadd.f32 %v673_v16, %v671_v14  ;;  %1053 = vmatpush.msra.mxu2 %v45_v1  ;;  %1056 = vmatpush.msra.mxu3 %v520_v10 }
  0x14   :  { %145 = vmatpush.msra.mxu0 %v44_v0  ;;  %618 = vmatpush.msra.mxu1 %v519_v9 }
  0x15   :  { %50 = vxpose.xlu0.b32.cont [2/4] (short) %v45_v1, 128  ;;  %v202_v21 = vrot.slane %v201_v19, 4  ;;  %v675_v22 = vadd.f32 %v674_v20, %v672_v18  ;;  %1054 = vmatpush.msra.mxu2 %v44_v0 }
  0x16   :  { %525 = vxpose.xlu2.b32.cont [2/4] (short) %v519_v9, 128  ;;  %619 = vmatpush.msra.mxu1 %v518_v4 }
  0x17   :  { %v203_v23 = vadd.f32 %v202_v21, %v201_v19  ;;  %1057 = vmatpush.msra.mxu3 %v519_v9  ;;  %v676_v28 = vrot.slane %v675_v22, 4 }
  0x19   :  { %v204_v24 = vrot.slane %v203_v23, 2  ;;  %1058 = vmatpush.msra.mxu3 %v518_v4  ;;  %v677_v29 = vadd.f32 %v676_v28, %v675_v22 }
  0x1b   :  { %v205_v25 = vadd.f32 %v204_v24, %v203_v23  ;;  %v678_v30 = vrot.slane %v677_v29, 2 }
  0x1d   :  { %51 = vxpose.xlu0.b32.cont [3/4] (short) %v46_v5, 128  ;;  %v206_v26 = vrot.slane %v205_v25, 1  ;;  %v679_v31 = vadd.f32 %v678_v30, %v677_v29  ;;  %v1227_v30 = vmov 0.0  }
  0x1e   :  { %526 = vxpose.xlu2.b32.cont [3/4] (short) %v520_v10, 128 }
  0x1f   :  { %v1250_v27 = vadd.f32 %v206_v26, %v205_v25  ;;  %v680_v32 = vrot.slane %v679_v31, 1 }
  0x21   :  { %208 = vxpose.xlu1.b32.start [1/16] %v1250_v27, 128  ;;  %v1268_v34 = vadd.f32 %v680_v32, %v679_v31 }
  0x25   :  { %52 = vxpose.xlu0.b32.end [4/4] (short) %v47_v6, 128 }
  0x26   :  { %527 = vxpose.xlu2.b32.end [4/4] (short) %v521_v17, 128 }
  0x29   :  { %209 = vxpose.xlu1.b32.cont [2/16] %v1250_v27, 128 }
  0x31   :  { %210 = vxpose.xlu1.b32.cont [3/16] %v1250_v27, 128 }
  0x39   :  { %211 = vxpose.xlu1.b32.cont [4/16] %v1250_v27, 128 }
  0x41   :  { %212 = vxpose.xlu1.b32.cont [5/16] %v1250_v27, 128 }
  0x49   :  { %213 = vxpose.xlu1.b32.cont [6/16] %v1250_v27, 128 }
  0x51   :  { %214 = vxpose.xlu1.b32.cont [7/16] %v1250_v27, 128 }
  0x59   :  { %215 = vxpose.xlu1.b32.cont [8/16] %v1250_v27, 128 }
  0x61   :  { %216 = vxpose.xlu1.b32.cont [9/16] %v1250_v27, 128 }
  0x69   :  { %217 = vxpose.xlu1.b32.cont [10/16] %v1250_v27, 128 }
  0x71   :  { %218 = vxpose.xlu1.b32.cont [11/16] %v1250_v27, 128 }
  0x79   :  { %219 = vxpose.xlu1.b32.cont [12/16] %v1250_v27, 128 }
  0x81   :  { %220 = vxpose.xlu1.b32.cont [13/16] %v1250_v27, 128 }
  0x89   :  { %221 = vxpose.xlu1.b32.cont [14/16] %v1250_v27, 128 }
  0x8d   :  { %307 = vxpose.xlu0.b32.start [1/16] %v1265_v33, 128 }
  0x8e   :  { %682 = vxpose.xlu2.b32.start [1/16] %v1268_v34, 128 }
  0x91   :  { %222 = vxpose.xlu1.b32.cont [15/16] %v1250_v27, 128 }
  0x95   :  { %308 = vxpose.xlu0.b32.cont [2/16] %v1265_v33, 128 }
  0x96   :  { %683 = vxpose.xlu2.b32.cont [2/16] %v1268_v34, 128 }
  0x99   :  { %223 = vxpose.xlu1.b32.end [16/16] %v1250_v27, 128 }
  0x9d   :  { %309 = vxpose.xlu0.b32.cont [3/16] %v1265_v33, 128 }
  0x9e   :  { %684 = vxpose.xlu2.b32.cont [3/16] %v1268_v34, 128 }
  0xa1   :  { %781 = vxpose.xlu1.b32.start [1/16] %v1276_v35, 128 }
  0xa5   :  { %310 = vxpose.xlu0.b32.cont [4/16] %v1265_v33, 128 }
  0xa6   :  { %685 = vxpose.xlu2.b32.cont [4/16] %v1268_v34, 128 }
  0xa7   :  { %v540_v36 = vpop.trf.xlu2 }
  0xa8   :  { %1035 = vmatmul.msk.f32.vlgmr.msra.gmra.mxu1 %vm81_vm0, %v540_v36 }
  0xa9   :  { %782 = vxpose.xlu1.b32.cont [2/16] %v1276_v35, 128 }
  0xad   :  { %311 = vxpose.xlu0.b32.cont [5/16] %v1265_v33, 128 }
  0xae   :  { %686 = vxpose.xlu2.b32.cont [5/16] %v1268_v34, 128 }
  0xaf   :  { %v541_v37 = vpop.trf.xlu2 }
  0xb0   :  { %1036 = vmatmul.msk.f32.gmra.mxu1 %vm81_vm0, %v541_v37 }
  0xb1   :  { %v65_v38 = vpop.trf.xlu0  ;;  %783 = vxpose.xlu1.b32.cont [3/16] %v1276_v35, 128 }
  0xb2   :  { %1019 = vmatmul.msk.f32.vlgmr.msra.gmra.mxu0 %vm81_vm0, %v65_v38 }
  0xb5   :  { %312 = vxpose.xlu0.b32.cont [6/16] %v1265_v33, 128 }
  0xb6   :  { %687 = vxpose.xlu2.b32.cont [6/16] %v1268_v34, 128 }
  0xb7   :  { %v542_v39 = vpop.trf.xlu2 }
  0xb8   :  { %1037 = vmatmul.msk.f32.gmra.mxu1 %vm81_vm0, %v542_v39 }
  0xb9   :  { %v66_v40 = vpop.trf.xlu0  ;;  %784 = vxpose.xlu1.b32.cont [4/16] %v1276_v35, 128 }
  0xba   :  { %1020 = vmatmul.msk.f32.gmra.mxu0 %vm81_vm0, %v66_v40 }
  0xbd   :  { %313 = vxpose.xlu0.b32.cont [7/16] %v1265_v33, 128 }
  0xbe   :  { %688 = vxpose.xlu2.b32.cont [7/16] %v1268_v34, 128 }
  0xbf   :  { %v543_v41 = vpop.trf.xlu2 }
  0xc0   :  { %1038 = vmatmul.msk.f32.gmra.mxu1 %vm81_vm0, %v543_v41 }
  0xc1   :  { %v67_v42 = vpop.trf.xlu0  ;;  %785 = vxpose.xlu1.b32.cont [5/16] %v1276_v35, 128 }
  0xc2   :  { %1021 = vmatmul.msk.f32.gmra.mxu0 %vm81_vm0, %v67_v42 }
  0xc5   :  { %v1300_v43 = vpop.trf.xlu1  ;;  %314 = vxpose.xlu0.b32.cont [8/16] %v1265_v33, 128 }
  0xc6   :  { %689 = vxpose.xlu2.b32.cont [8/16] %v1268_v34, 128  ;;  %v240_v22 = vadd.f32 %v1300_v43, %v1250_v27 }
  0xc7   :  { %v544_v44 = vpop.trf.xlu2 }
  0xc8   :  { %1039 = vmatmul.msk.f32.gmra.mxu1 %vm81_vm0, %v544_v44 }
  0xc9   :  { %v68_v45 = vpop.trf.xlu0  ;;  %786 = vxpose.xlu1.b32.cont [6/16] %v1276_v35, 128 }
  0xca   :  { %1022 = vmatmul.msk.f32.gmra.mxu0 %vm81_vm0, %v68_v45 }
  0xcd   :  { %v1307_v46 = vpop.trf.xlu1  ;;  %315 = vxpose.xlu0.b32.cont [9/16] %v1265_v33, 128 }
  0xce   :  { %690 = vxpose.xlu2.b32.cont [9/16] %v1268_v34, 128  ;;  %v241_v42 = vadd.f32 %v1307_v46, %v1250_v27 }
  0xcf   :  { %v545_v47 = vpop.trf.xlu2 }
  0xd0   :  { %1040 = vmatmul.msk.f32.gmra.mxu1 %vm81_vm0, %v545_v47 }
  0xd1   :  { %v69_v48 = vpop.trf.xlu0  ;;  %787 = vxpose.xlu1.b32.cont [7/16] %v1276_v35, 128 }
  0xd2   :  { %1023 = vmatmul.msk.f32.gmra.mxu0 %vm81_vm0, %v69_v48 }
  0xd5   :  { %v1314_v49 = vpop.trf.xlu1  ;;  %316 = vxpose.xlu0.b32.cont [10/16] %v1265_v33, 128 }
  0xd6   :  { %691 = vxpose.xlu2.b32.cont [10/16] %v1268_v34, 128 }
  0xd7   :  { %v546_v50 = vpop.trf.xlu2 }
  0xd8   :  { %1041 = vmatmul.msk.f32.gmra.mxu1 %vm81_vm0, %v546_v50 }
  0xd9   :  { %v70_v51 = vpop.trf.xlu0  ;;  %788 = vxpose.xlu1.b32.cont [8/16] %v1276_v35, 128 }
  0xda   :  { %1024 = vmatmul.msk.f32.gmra.mxu0 %vm81_vm0, %v70_v51 }
  0xdd   :  { %v1321_v52 = vpop.trf.xlu1  ;;  %317 = vxpose.xlu0.b32.cont [11/16] %v1265_v33, 128 }
  0xde   :  { %692 = vxpose.xlu2.b32.cont [11/16] %v1268_v34, 128 }
  0xdf   :  { %v547_v53 = vpop.trf.xlu2 }
  0xe0   :  { %1042 = vmatmul.msk.f32.gmra.mxu1 %vm81_vm0, %v547_v53 }
  0xe1   :  { %v71_v54 = vpop.trf.xlu0  ;;  %789 = vxpose.xlu1.b32.cont [9/16] %v1276_v35, 128 }
  0xe2   :  { %1025 = vmatmul.msk.f32.gmra.mxu0 %vm81_vm0, %v71_v54 }
  0xe5   :  { %v1328_v55 = vpop.trf.xlu1  ;;  %318 = vxpose.xlu0.b32.cont [12/16] %v1265_v33, 128 }
  0xe6   :  { %693 = vxpose.xlu2.b32.cont [12/16] %v1268_v34, 128 }
  0xe7   :  { %v548_v56 = vpop.trf.xlu2 }
  0xe8   :  { %1043 = vmatmul.msk.f32.vlgmr.msra.gmra.mxu3 %vm81_vm0, %v548_v56 }
  0xe9   :  { %v72_v57 = vpop.trf.xlu0  ;;  %790 = vxpose.xlu1.b32.cont [10/16] %v1276_v35, 128 }
  0xea   :  { %1026 = vmatmul.msk.f32.gmra.mxu0 %vm81_vm0, %v72_v57 }
  0xed   :  { %v1335_v58 = vpop.trf.xlu1  ;;  %319 = vxpose.xlu0.b32.cont [13/16] %v1265_v33, 128 }
  0xee   :  { %694 = vxpose.xlu2.b32.cont [13/16] %v1268_v34, 128 }
  0xef   :  { %v549_v59 = vpop.trf.xlu2 }
  0xf0   :  { %1044 = vmatmul.msk.f32.gmra.mxu3 %vm81_vm0, %v549_v59 }
  0xf1   :  { %v73_v60 = vpop.trf.xlu0  ;;  %791 = vxpose.xlu1.b32.cont [11/16] %v1276_v35, 128 }
  0xf2   :  { %1027 = vmatmul.msk.f32.vlgmr.msra.gmra.mxu2 %vm81_vm0, %v73_v60 }
  0xf5   :  { %v1342_v61 = vpop.trf.xlu1  ;;  %320 = vxpose.xlu0.b32.cont [14/16] %v1265_v33, 128 }
  0xf6   :  { %695 = vxpose.xlu2.b32.cont [14/16] %v1268_v34, 128 }
  0xf7   :  { %v550_v62 = vpop.trf.xlu2 }
  0xf8   :  { %1045 = vmatmul.msk.f32.gmra.mxu3 %vm81_vm0, %v550_v62 }
  0xf9   :  { %v74_v63 = vpop.trf.xlu0  ;;  %792 = vxpose.xlu1.b32.cont [12/16] %v1276_v35, 128 }
  0xfa   :  { %1028 = vmatmul.msk.f32.gmra.mxu2 %vm81_vm0, %v74_v63 }
  0xfd   :  { %v1349_v0 = vpop.trf.xlu1  ;;  %321 = vxpose.xlu0.b32.cont [15/16] %v1265_v33, 128 }
  0xfe   :  { %696 = vxpose.xlu2.b32.cont [15/16] %v1268_v34, 128 }
  0xff   :  { %v551_v1 = vpop.trf.xlu2 }
 0x100   :  { %1046 = vmatmul.msk.f32.gmra.mxu3 %vm81_vm0, %v551_v1 }
 0x101   :  { %v75_v2 = vpop.trf.xlu0  ;;  %793 = vxpose.xlu1.b32.cont [13/16] %v1276_v35, 128 }
 0x102   :  { %1029 = vmatmul.msk.f32.gmra.mxu2 %vm81_vm0, %v75_v2 }
 0x105   :  { %v1356_v3 = vpop.trf.xlu1  ;;  %322 = vxpose.xlu0.b32.end [16/16] %v1265_v33, 128 }
 0x106   :  { %697 = vxpose.xlu2.b32.end [16/16] %v1268_v34, 128 }
 0x107   :  { %v552_v4 = vpop.trf.xlu2 }
 0x108   :  { %1047 = vmatmul.msk.f32.gmra.mxu3 %vm81_vm0, %v552_v4 }
 0x109   :  { %v76_v5 = vpop.trf.xlu0  ;;  %794 = vxpose.xlu1.b32.cont [14/16] %v1276_v35, 128 }
 0x10a   :  { %1030 = vmatmul.msk.f32.gmra.mxu2 %vm81_vm0, %v76_v5 }
 0x10d   :  { %v1363_v6 = vpop.trf.xlu1 }
 0x10f   :  { %v553_v7 = vpop.trf.xlu2 }
 0x110   :  { %1048 = vmatmul.msk.f32.gmra.mxu3 %vm81_vm0, %v553_v7 }
 0x111   :  { %v77_v8 = vpop.trf.xlu0  ;;  %795 = vxpose.xlu1.b32.cont [15/16] %v1276_v35, 128 }
 0x112   :  { %1031 = vmatmul.msk.f32.gmra.mxu2 %vm81_vm0, %v77_v8  ;;  %v242_v8 = vadd.f32 %v1314_v49, %v1250_v27 }
 0x115   :  { %v1368_v9 = vpop.trf.xlu1 }
 0x117   :  { %v554_v10 = vpop.trf.xlu2 }
 0x118   :  { %1049 = vmatmul.msk.f32.gmra.mxu3 %vm81_vm0, %v554_v10 }
 0x119   :  { %v78_v11 = vpop.trf.xlu0  ;;  %796 = vxpose.xlu1.b32.end [16/16] %v1276_v35, 128 }
 0x11a   :  { %1032 = vmatmul.msk.f32.gmra.mxu2 %vm81_vm0, %v78_v11 }
 0x11d   :  { %v1373_v12 = vpop.trf.xlu1 }
 0x11f   :  { %v555_v13 = vpop.trf.xlu2 }
 0x120   :  { %1050 = vmatmul.msk.f32.gmra.mxu3 %vm81_vm0, %v555_v13 }
 0x121   :  { %v79_v14 = vpop.trf.xlu0 }
 0x122   :  { %1033 = vmatmul.msk.f32.gmra.mxu2 %vm81_vm0, %v79_v14 }
 0x125   :  { %v1377_v15 = vpop.trf.xlu1  ;;  %v621_v17 = vpop.f32.mrf.mxu1 }
 0x126   :  { %v730_v28 = vmul.f32 2.0, %v621_v17 }
 0x127   :  { %v698_v16 = vpop.trf.xlu2 }
 0x128   :  { %v714_v26 = vadd.f32 %v698_v16, %v1268_v34 }
 0x129   :  { %v80_v18 = vpop.trf.xlu0 }
 0x12a   :  { %1034 = vmatmul.msk.f32.gmra.mxu2 %vm81_vm0, %v80_v18  ;;  %v746_v39 = vsub.f32 %v714_v26, %v730_v28 }
 0x12c   :  { %v762_v47 = vmax.f32 %v746_v39, 0.0 }
 0x12d   :  { %v1380_v19 = vpop.trf.xlu1  ;;  %v624_v29 = vpop.f32.mrf.mxu1 }
 0x12e   :  { %v731_v53 = vmul.f32 2.0, %v624_v29  ;;  %v877_v46 = vadd.f32 1.0, %v762_v47 }
 0x12f   :  { %v147_v20 = vpop.f32.mrf.mxu0  ;;  %v699_v21 = vpop.trf.xlu2 }
 0x130   :  { %v256_v23 = vmul.f32 2.0, %v147_v20  ;;  %v715_v51 = vadd.f32 %v699_v21, %v1268_v34 }
 0x131   :  { %v323_v24 = vpop.trf.xlu0 }
 0x132   :  { %v272_v25 = vsub.f32 %v240_v22, %v256_v23  ;;  %vm339_vm1 = vcmp.eq.f32.partialorder %v323_v24, %v1265_v33  ;;  %v747_v2 = vsub.f32 %v715_v51, %v731_v53 }
 0x133   :  { %v355_v31 = vsel %vm339_vm1, 1.0, %v1227_v30 }
 0x134   :  { %v288_v32 = vmax.f32 %v272_v25, 0.0  ;;  %v387_v48 = vsub.f32 1.0, %v355_v31  ;;  %v763_v17 = vmax.f32 %v747_v2, 0.0 }
 0x135   :  { %v1387_v36 = vpop.trf.xlu1  ;;  %v627_v56 = vpop.f32.mrf.mxu1 }
 0x136   :  { %v403_v37 = vadd.f32 1.0, %v288_v32  ;;  %v371_v38 = vmul.f32 %v355_v31, %v288_v32  ;;  %v732_v5 = vmul.f32 2.0, %v627_v56  ;;  %v878_v28 = vadd.f32 1.0, %v763_v17 }
 0x137   :  { %v150_v40 = vpop.f32.mrf.mxu0  ;;  %v700_v41 = vpop.trf.xlu2 }
 0x138   :  { %1077 = vrcp.f32 %v403_v37  ;;  %v257_v43 = vmul.f32 2.0, %v150_v40  ;;  %v716_v4 = vadd.f32 %v700_v41, %v1268_v34 }
 0x139   :  { %v324_v44 = vpop.trf.xlu0 }
 0x13a   :  { %v273_v45 = vsub.f32 %v241_v42, %v257_v43  ;;  %vm340_vm2 = vcmp.eq.f32.partialorder %v324_v44, %v1265_v33  ;;  %v748_v20 = vsub.f32 %v716_v4, %v732_v5  ;;  %v243_v42 = vadd.f32 %v1321_v52, %v1250_v27 }
 0x13b   :  { %v356_v50 = vsel %vm340_vm2, 1.0, %v1227_v30 }
 0x13c   :  { %v289_v54 = vmax.f32 %v273_v45, 0.0  ;;  %v388_v16 = vsub.f32 1.0, %v356_v50  ;;  %v1403_v32 = vmax.f32 %v748_v20, 0.0 }
 0x13d   :  { %v1394_v57 = vpop.trf.xlu1  ;;  %v630_v49 = vpop.f32.mrf.mxu1 }
 0x13e   :  { %v1078_v59 = vpop.eup %1077  ;;  %v404_v60 = vadd.f32 1.0, %v289_v54  ;;  %v372_v62 = vmul.f32 %v356_v50, %v289_v54  ;;  %v879_v56 = vadd.f32 1.0, %v1403_v32  ;;  %v733_v52 = vmul.f32 2.0, %v630_v49 }
 0x13f   :  { %v435_v63 = vmul.f32 %v1078_v59, %v387_v48  ;;  %v153_v1 = vpop.f32.mrf.mxu0  ;;  %v701_v7 = vpop.trf.xlu2 }
 0x140   :  { %1079 = vrcp.f32 %v404_v60  ;;  %v467_v10 = vadd.f32 %v372_v62, %v371_v38  ;;  %v258_v11 = vmul.f32 2.0, %v153_v1 }
 0x141   :  { %v325_v13 = vpop.trf.xlu0  ;;  %1081 = vrcp.f32 %v877_v46  ;;  %v451_v43 = vmul.f32 2.0, %v435_v63  ;;  %v717_v46 = vadd.f32 %v701_v7, %v1268_v34  ;;  %v244_v63 = vadd.f32 %v1328_v55, %v1250_v27 }
 0x142   :  { %v274_v14 = vsub.f32 %v242_v8, %v258_v11  ;;  %vm341_vm3 = vcmp.eq.f32.partialorder %v325_v13, %v1265_v33 }
 0x143   :  { %v357_v18 = vsel %vm341_vm3, 1.0, %v1227_v30  ;;  %v749_v55 = vsub.f32 %v717_v46, %v733_v52 }
 0x144   :  { %v290_v21 = vmax.f32 %v274_v14, 0.0  ;;  %v389_v53 = vsub.f32 1.0, %v357_v18 }
 0x145   :  { %v797_v22 = vpop.trf.xlu1  ;;  %v633_v7 = vpop.f32.mrf.mxu1 }
 0x146   :  { %v1080_v23 = vpop.eup %1079  ;;  %v405_v24 = vadd.f32 1.0, %v290_v21  ;;  %v373_v25 = vmul.f32 %v357_v18, %v290_v21  ;;  %vm813_vm4 = vcmp.eq.f32.partialorder %v797_v22, %v1276_v35 }
 0x147   :  { %v436_v26 = vmul.f32 %v1080_v23, %v388_v16  ;;  %v829_v29 = vsel %vm813_vm4, 1.0, %v1227_v30  ;;  %v156_v31 = vpop.f32.mrf.mxu0  ;;  %v702_v37 = vpop.trf.xlu2 }
 0x148   :  { %v1082_v38 = vpop.eup %1081  ;;  %1083 = vrcp.f32 %v405_v24  ;;  %v468_v39 = vadd.f32 %v467_v10, %v373_v25  ;;  %v845_v40 = vmul.f32 %v829_v29, %v762_v47  ;;  %v861_v41 = vsub.f32 1.0, %v829_v29 }
 0x149   :  { %v452_v44 = vmul.f32 2.0, %v436_v26  ;;  %v259_v45 = vmul.f32 2.0, %v156_v31  ;;  %v326_v48 = vpop.trf.xlu0  ;;  %1085 = vrcp.f32 %v878_v28  ;;  %v718_v26 = vadd.f32 %v702_v37, %v1268_v34 }
 0x14a   :  { %v909_v50 = vmul.f32 %v1082_v38, %v861_v41  ;;  %vm342_vm5 = vcmp.eq.f32.partialorder %v326_v48, %v1265_v33  ;;  %1087 = vrcp.f32 %v879_v56  ;;  %v765_v41 = vmax.f32 %v749_v55, 0.0 }
 0x14b   :  { %v492_v51 = vadd.f32 %v452_v44, %v451_v43  ;;  %v275_v54 = vsub.f32 %v243_v42, %v259_v45  ;;  %v358_v59 = vsel %vm342_vm5, 1.0, %v1227_v30 }
 0x14c   :  { %v925_v28 = vmul.f32 2.0, %v909_v50  ;;  %v390_v29 = vsub.f32 1.0, %v358_v59 }
 0x14d   :  { %v291_v47 = vmax.f32 %v275_v54, 0.0  ;;  %v798_v60 = vpop.trf.xlu1 }
 0x14e   :  { %v1084_v62 = vpop.eup %1083  ;;  %vm814_vm6 = vcmp.eq.f32.partialorder %v798_v60, %v1276_v35 }
 0x14f   :  { %v437_v1 = vmul.f32 %v1084_v62, %v389_v53  ;;  %v406_v2 = vadd.f32 1.0, %v291_v47  ;;  %v374_v4 = vmul.f32 %v358_v59, %v291_v47  ;;  %v830_v5 = vsel %vm814_vm6, 1.0, %v1227_v30  ;;  %v159_v8 = vpop.f32.mrf.mxu0  ;;  %v1415_v10 = vpop.trf.xlu2 }
 0x150   :  { %v846_v11 = vmul.f32 %v830_v5, %v763_v17  ;;  %v862_v13 = vsub.f32 1.0, %v830_v5  ;;  %v260_v14 = vmul.f32 2.0, %v159_v8  ;;  %v1086_v16 = vpop.eup %1085  ;;  %v734_v17 = vmul.f32 2.0, %v633_v7 }
 0x151   :  { %v453_v18 = vmul.f32 2.0, %v437_v1  ;;  %1089 = vrcp.f32 %v406_v2  ;;  %v469_v20 = vadd.f32 %v468_v39, %v374_v4  ;;  %v327_v21 = vpop.trf.xlu0  ;;  %v1088_v39 = vpop.eup %1087  ;;  %v245_v59 = vadd.f32 %v1335_v58, %v1250_v27 }
 0x152   :  { %v910_v22 = vmul.f32 %v1086_v16, %v862_v13  ;;  %v941_v23 = vadd.f32 %v846_v11, %v845_v40  ;;  %v276_v24 = vsub.f32 %v244_v63, %v260_v14  ;;  %vm343_vm7 = vcmp.eq.f32.partialorder %v327_v21, %v1265_v33 }
 0x153   :  { %v493_v25 = vadd.f32 %v492_v51, %v453_v18  ;;  %v359_v49 = vsel %vm343_vm7, 1.0, %v1227_v30  ;;  %v750_v53 = vsub.f32 %v718_v26, %v734_v17  ;;  %v880_v47 = vadd.f32 1.0, %v765_v41 }
 0x154   :  { %v926_v31 = vmul.f32 2.0, %v910_v22  ;;  %v292_v38 = vmax.f32 %v276_v24, 0.0  ;;  %v391_v1 = vsub.f32 1.0, %v359_v49  ;;  %v246_v22 = vadd.f32 %v1342_v61, %v1250_v27 }
 0x155   :  { %v799_v42 = vpop.trf.xlu1  ;;  %v766_v8 = vmax.f32 %v750_v53, 0.0 }
 0x156   :  { %v966_v43 = vadd.f32 %v926_v31, %v925_v28  ;;  %v407_v44 = vadd.f32 1.0, %v292_v38  ;;  %v375_v45 = vmul.f32 %v359_v49, %v292_v38  ;;  %vm815_vm8 = vcmp.eq.f32.partialorder %v799_v42, %v1276_v35 }
 0x157   :  { %v1090_v40 = vpop.eup %1089  ;;  %v831_v48 = vsel %vm815_vm8, 1.0, %v1227_v30  ;;  %v162_v51 = vpop.f32.mrf.mxu0 }
 0x158   :  { %v1422_v54 = vpop.trf.xlu2  ;;  %v438_v37 = vmul.f32 %v1090_v40, %v390_v29  ;;  %1091 = vrcp.f32 %v407_v44  ;;  %v470_v50 = vadd.f32 %v469_v20, %v375_v45  ;;  %v847_v56 = vmul.f32 %v831_v48, %v1403_v32 }
 0x159   :  { %v863_v60 = vsub.f32 1.0, %v831_v48  ;;  %v261_v46 = vmul.f32 2.0, %v162_v51  ;;  %v328_v52 = vpop.trf.xlu0  ;;  %1093 = vrcp.f32 %v880_v47 }
 0x15a   :  { %v454_v62 = vmul.f32 2.0, %v438_v37  ;;  %v942_v63 = vadd.f32 %v941_v23, %v847_v56  ;;  %vm344_vm9 = vcmp.eq.f32.partialorder %v328_v52, %v1265_v33  ;;  %v881_v23 = vadd.f32 1.0, %v766_v8 }
 0x15b   :  { %v911_v2 = vmul.f32 %v1088_v39, %v863_v60  ;;  %v277_v4 = vsub.f32 %v245_v59, %v261_v46  ;;  %v360_v11 = vsel %vm344_vm9, 1.0, %v1227_v30  ;;  %v247_v46 = vadd.f32 %v1349_v0, %v1250_v27 }
 0x15c   :  { %v494_v5 = vadd.f32 %v493_v25, %v454_v62  ;;  %v392_v61 = vsub.f32 1.0, %v360_v11 }
 0x15d   :  { %v927_v32 = vmul.f32 2.0, %v911_v2  ;;  %v293_v13 = vmax.f32 %v277_v4, 0.0  ;;  %v800_v14 = vpop.trf.xlu1 }
 0x15e   :  { %v1092_v58 = vpop.eup %1091  ;;  %vm816_vm10 = vcmp.eq.f32.partialorder %v800_v14, %v1276_v35 }
 0x15f   :  { %v439_v7 = vmul.f32 %v1092_v58, %v391_v1  ;;  %v967_v16 = vadd.f32 %v966_v43, %v927_v32  ;;  %v408_v18 = vadd.f32 1.0, %v293_v13  ;;  %v376_v20 = vmul.f32 %v360_v11, %v293_v13  ;;  %v165_v55 = vpop.f32.mrf.mxu0  ;;  %v1094_v38 = vpop.eup %1093 }
 0x160   :  { %v1430_v21 = vpop.trf.xlu2  ;;  %v832_v24 = vsel %vm816_vm10, 1.0, %v1227_v30  ;;  %v262_v25 = vmul.f32 2.0, %v165_v55 }
 0x161   :  { %v455_v49 = vmul.f32 2.0, %v439_v7  ;;  %1095 = vrcp.f32 %v408_v18  ;;  %v471_v26 = vadd.f32 %v470_v50, %v376_v20  ;;  %v848_v17 = vmul.f32 %v832_v24, %v765_v41  ;;  %v329_v28 = vpop.trf.xlu0 }
 0x162   :  { %v864_v29 = vsub.f32 1.0, %v832_v24  ;;  %v278_v31 = vsub.f32 %v246_v22, %v262_v25  ;;  %vm345_vm11 = vcmp.eq.f32.partialorder %v329_v28, %v1265_v33  ;;  %1097 = vrcp.f32 %v881_v23 }
 0x163   :  { %v495_v42 = vadd.f32 %v494_v5, %v455_v49  ;;  %v943_v39 = vadd.f32 %v942_v63, %v848_v17  ;;  %v361_v43 = vsel %vm345_vm11, 1.0, %v1227_v30 }
 0x164   :  { %v912_v44 = vmul.f32 %v1094_v38, %v864_v29  ;;  %v294_v45 = vmax.f32 %v278_v31, 0.0  ;;  %v393_v5 = vsub.f32 1.0, %v361_v43 }
 0x165   :  { %v801_v40 = vpop.trf.xlu1 }
 0x166   :  { %v928_v48 = vmul.f32 2.0, %v912_v44  ;;  %v409_v51 = vadd.f32 1.0, %v294_v45  ;;  %v377_v53 = vmul.f32 %v361_v43, %v294_v45  ;;  %vm817_vm12 = vcmp.eq.f32.partialorder %v801_v40, %v1276_v35 }
 0x167   :  { %v1096_v41 = vpop.eup %1095  ;;  %v833_v37 = vsel %vm817_vm12, 1.0, %v1227_v30  ;;  %v168_v50 = vpop.f32.mrf.mxu0 }
 0x168   :  { %v1439_v56 = vpop.trf.xlu2  ;;  %v440_v59 = vmul.f32 %v1096_v41, %v392_v61  ;;  %v968_v47 = vadd.f32 %v967_v16, %v928_v48  ;;  %1099 = vrcp.f32 %v409_v51  ;;  %v472_v60 = vadd.f32 %v471_v26, %v377_v53  ;;  %v1098_v2 = vpop.eup %1097 }
 0x169   :  { %v849_v52 = vmul.f32 %v833_v37, %v766_v8  ;;  %v865_v62 = vsub.f32 1.0, %v833_v37  ;;  %v263_v63 = vmul.f32 2.0, %v168_v50  ;;  %v330_v1 = vpop.trf.xlu0  ;;  %v636_v16 = vpop.f32.mrf.mxu1  ;;  %v248_v61 = vadd.f32 %v1356_v3, %v1250_v27 }
 0x16a   :  { %v456_v4 = vmul.f32 2.0, %v440_v59  ;;  %vm346_vm13 = vcmp.eq.f32.partialorder %v330_v1, %v1265_v33  ;;  %v719_v53 = vadd.f32 %v1415_v10, %v1268_v34  ;;  %v735_v41 = vmul.f32 2.0, %v636_v16 }
 0x16b   :  { %v913_v11 = vmul.f32 %v1098_v2, %v865_v62  ;;  %v1444_v32 = vadd.f32 %v943_v39, %v849_v52  ;;  %v279_v13 = vsub.f32 %v247_v46, %v263_v63  ;;  %v1446_v14 = vpop.f32.mrf.mxu3  ;;  %v362_v7 = vsel %vm346_vm13, 1.0, %v1227_v30 }
 0x16c   :  { %v496_v58 = vadd.f32 %v495_v42, %v456_v4  ;;  %v394_v31 = vsub.f32 1.0, %v362_v7  ;;  %v249_v63 = vadd.f32 %v1363_v6, %v1250_v27  ;;  %v751_v1 = vsub.f32 %v719_v53, %v735_v41 }
 0x16d   :  { %v929_v0 = vmul.f32 2.0, %v913_v11  ;;  %v295_v8 = vmax.f32 %v279_v13, 0.0  ;;  %v1449_v18 = vpop.trf.xlu1  ;;  %v720_v10 = vadd.f32 %v1422_v54, %v1268_v34 }
 0x16e   :  { %v1100_v20 = vpop.eup %1099  ;;  %v767_v6 = vmax.f32 %v751_v1, 0.0  ;;  %vm818_vm1 = vcmp.eq.f32.partialorder %v1449_v18, %v1276_v35 }
 0x16f   :  { %v441_v55 = vmul.f32 %v1100_v20, %v393_v5  ;;  %v1451_v22 = vadd.f32 %v968_v47, %v929_v0  ;;  %v410_v23 = vadd.f32 1.0, %v295_v8  ;;  %v378_v24 = vmul.f32 %v362_v7, %v295_v8 }
 0x170   :  { %v1453_v25 = vpop.trf.xlu2 }
 0x171   :  { %v457_v49 = vmul.f32 2.0, %v441_v55  ;;  %1101 = vrcp.f32 %v410_v23  ;;  %v473_v26 = vadd.f32 %v472_v60, %v378_v24  ;;  %v331_v17 = vpop.trf.xlu0  ;;  %v639_v44 = vpop.f32.mrf.mxu1  ;;  %v721_v23 = vadd.f32 %v1430_v21, %v1268_v34 }
 0x172   :  { %vm347_vm14 = vcmp.eq.f32.partialorder %v331_v17, %v1265_v33  ;;  %v736_v4 = vmul.f32 2.0, %v639_v44 }
 0x173   :  { %v497_v28 = vadd.f32 %v496_v58, %v457_v49  ;;  %v1455_v29 = vpop.f32.mrf.mxu3  ;;  %v363_v50 = vsel %vm347_vm14, 1.0, %v1227_v30 }
 0x174   :  { %v395_v0 = vsub.f32 1.0, %v363_v50  ;;  %v752_v20 = vsub.f32 %v720_v10, %v736_v4 }
 0x175   :  { %v1457_v38 = vpop.trf.xlu1  ;;  %v171_v42 = vpop.f32.mrf.mxu2 }
 0x176   :  { %v264_v39 = vmul.f32 2.0, %v171_v42  ;;  %vm819_vm2 = vcmp.eq.f32.partialorder %v1457_v38, %v1276_v35  ;;  %v1536_v38 = vadd.f32 %v1387_v36, %v1250_v27 }
 0x177   :  { %v1102_v43 = vpop.eup %1101 }
 0x178   :  { %v1462_v45 = vpop.trf.xlu2  ;;  %v442_v40 = vmul.f32 %v1102_v43, %v394_v31  ;;  %v280_v48 = vsub.f32 %v248_v61, %v264_v39  ;;  %v250_v31 = vadd.f32 %v1368_v9, %v1250_v27  ;;  %v882_v43 = vadd.f32 1.0, %v767_v6 }
 0x179   :  { %v332_v51 = vpop.trf.xlu0  ;;  %v642_v58 = vpop.f32.mrf.mxu1  ;;  %v1487_v61 = vmax.f32 %v752_v20, 0.0  ;;  %v835_v20 = vsel %vm819_vm2, 1.0, %v1227_v30 }
 0x17a   :  { %v458_v37 = vmul.f32 2.0, %v442_v40  ;;  %v296_v59 = vmax.f32 %v280_v48, 0.0  ;;  %vm348_vm15 = vcmp.eq.f32.partialorder %v332_v51, %v1265_v33  ;;  %v737_v54 = vmul.f32 2.0, %v642_v58 }
 0x17b   :  { %v1467_v47 = vpop.f32.mrf.mxu3  ;;  %v364_v7 = vsel %vm348_vm15, 1.0, %v1227_v30  ;;  %v722_v48 = vadd.f32 %v1439_v56, %v1268_v34  ;;  %v738_v51 = vmul.f32 2.0, %v1446_v14  ;;  %v1506_v56 = vadd.f32 %v1380_v19, %v1250_v27 }
 0x17c   :  { %v498_v60 = vadd.f32 %v497_v28, %v458_v37  ;;  %v411_v3 = vadd.f32 1.0, %v296_v59  ;;  %v379_v46 = vmul.f32 %v363_v50, %v296_v59  ;;  %v753_v21 = vsub.f32 %v721_v23, %v737_v54 }
 0x17d   :  { %v1469_v52 = vpop.trf.xlu1  ;;  %v174_v62 = vpop.f32.mrf.mxu2  ;;  %v396_v9 = vsub.f32 1.0, %v364_v7  ;;  %v251_v50 = vadd.f32 %v1373_v12, %v1250_v27  ;;  %v834_v12 = vsel %vm818_vm1, 1.0, %v1227_v30  ;;  %v754_v1 = vsub.f32 %v722_v48, %v738_v51 }
 0x17e   :  { %v265_v2 = vmul.f32 2.0, %v174_v62  ;;  %1103 = vrcp.f32 %v411_v3  ;;  %v474_v5 = vadd.f32 %v473_v26, %v379_v46  ;;  %v1502_v46 = vadd.f32 %v1377_v15, %v1250_v27 }
 0x17f   :  { %vm820_vm4 = vcmp.eq.f32.partialorder %v1469_v52, %v1276_v35  ;;  %v740_v48 = vmul.f32 2.0, %v1467_v47 }
 0x180   :  { %v1476_v11 = vpop.trf.xlu2  ;;  %v281_v13 = vsub.f32 %v249_v63, %v265_v2  ;;  %v883_v63 = vadd.f32 1.0, %v1487_v61 }
 0x181   :  { %v333_v16 = vpop.trf.xlu0 }
 0x182   :  { %v297_v8 = vmax.f32 %v281_v13, 0.0  ;;  %vm349_vm0 = vcmp.eq.f32.partialorder %v333_v16, %v1265_v33  ;;  %v739_v13 = vmul.f32 2.0, %v1455_v29 }
 0x183   :  { %v1479_v55 = vpop.f32.mrf.mxu3  ;;  %v365_v3 = vsel %vm349_vm0, 1.0, %v1227_v30 }
 0x184   :  { %v412_v24 = vadd.f32 1.0, %v297_v8  ;;  %v380_v49 = vmul.f32 %v364_v7, %v297_v8  ;;  %v1104_v26 = vpop.eup %1103  ;;  %v866_v7 = vsub.f32 1.0, %v834_v12 }
 0x185   :  { %v1483_v17 = vpop.trf.xlu1  ;;  %v177_v28 = vpop.f32.mrf.mxu2  ;;  %v443_v42 = vmul.f32 %v1104_v26, %v395_v0 }
 0x186   :  { %1105 = vrcp.f32 %v412_v24  ;;  %v475_v39 = vadd.f32 %v474_v5, %v380_v49  ;;  %v266_v44 = vmul.f32 2.0, %v177_v28  ;;  %v723_v5 = vadd.f32 %v1453_v25, %v1268_v34 }
 0x187   :  { %v459_v40 = vmul.f32 2.0, %v443_v42  ;;  %1107 = vrcp.f32 %v882_v43  ;;  %v850_v25 = vmul.f32 %v834_v12, %v767_v6  ;;  %v1527_v24 = vmax.f32 %v754_v1, 0.0 }
 0x188   :  { %v1493_v53 = vpop.trf.xlu2  ;;  %v282_v41 = vsub.f32 %v250_v31, %v266_v44  ;;  %v755_v28 = vsub.f32 %v723_v5, %v739_v13  ;;  %v397_v31 = vsub.f32 1.0, %v365_v3  ;;  %v1540_v6 = vadd.f32 %v1394_v57, %v1250_v27 }
 0x189   :  { %v334_v37 = vpop.trf.xlu0  ;;  %v499_v59 = vadd.f32 %v498_v60, %v459_v40  ;;  %v1512_v60 = vmax.f32 %v753_v21, 0.0  ;;  %v867_v44 = vsub.f32 1.0, %v835_v20  ;;  %v724_v40 = vadd.f32 %v1462_v45, %v1268_v34 }
 0x18a   :  { %v298_v14 = vmax.f32 %v282_v41, 0.0  ;;  %vm350_vm3 = vcmp.eq.f32.partialorder %v334_v37, %v1265_v33  ;;  %v945_v37 = vadd.f32 %v1444_v32, %v850_v25  ;;  %v885_v36 = vadd.f32 1.0, %v1527_v24 }
 0x18b   :  { %v1508_v18 = vpop.f32.mrf.mxu3  ;;  %v884_v8 = vadd.f32 1.0, %v1512_v60  ;;  %v366_v49 = vsel %vm350_vm3, 1.0, %v1227_v30  ;;  %v836_v27 = vsel %vm820_vm4, 1.0, %v1227_v30  ;;  %v1555_v45 = vmax.f32 %v755_v28, 0.0 }
 0x18c   :  { %v1106_v62 = vpop.eup %1105  ;;  %v413_v2 = vadd.f32 1.0, %v298_v14  ;;  %v381_v10 = vmul.f32 %v365_v3, %v298_v14  ;;  %v868_v12 = vsub.f32 1.0, %v836_v27  ;;  %v756_v52 = vsub.f32 %v724_v40, %v740_v48 }
 0x18d   :  { %v444_v15 = vmul.f32 %v1106_v62, %v396_v9  ;;  %v1516_v19 = vpop.trf.xlu1  ;;  %v180_v4 = vpop.f32.mrf.mxu2  ;;  %v886_v13 = vadd.f32 1.0, %v1555_v45  ;;  %vm821_vm6 = vcmp.eq.f32.partialorder %v1483_v17, %v1276_v35 }
 0x18e   :  { %v267_v58 = vmul.f32 2.0, %v180_v4  ;;  %1109 = vrcp.f32 %v413_v2  ;;  %v476_v0 = vadd.f32 %v475_v39, %v381_v10  ;;  %v1108_v54 = vpop.eup %1107  ;;  %v725_v2 = vadd.f32 %v1476_v11, %v1268_v34 }
 0x18f   :  { %v460_v16 = vmul.f32 2.0, %v444_v15  ;;  %1111 = vrcp.f32 %v883_v63  ;;  %v914_v43 = vmul.f32 %v1108_v54, %v866_v7  ;;  %v851_v63 = vmul.f32 %v835_v20, %v1487_v61 }
 0x190   :  { %v283_v23 = vsub.f32 %v251_v50, %v267_v58  ;;  %v1532_v39 = vpop.trf.xlu2  ;;  %1113 = vrcp.f32 %v884_v8  ;;  %v398_v15 = vsub.f32 1.0, %v366_v49  ;;  %v741_v10 = vmul.f32 2.0, %v1479_v55 }
 0x191   :  { %v500_v29 = vadd.f32 %v499_v59, %v460_v16  ;;  %v335_v26 = vpop.trf.xlu0  ;;  %v930_v14 = vmul.f32 2.0, %v914_v43  ;;  %v946_v8 = vadd.f32 %v945_v37, %v851_v63  ;;  %v852_v55 = vmul.f32 %v836_v27, %v1512_v60  ;;  %v1577_v60 = vld [vmem:[#allocation5] ss:$0 sm:$0xff] }
 0x192   :  { %v299_v42 = vmax.f32 %v283_v23, 0.0  ;;  %vm351_vm5 = vcmp.eq.f32.partialorder %v335_v26, %v1265_v33  ;;  %v1569_v20 = vmax.f32 %v756_v52, 0.0 }
 0x193   :  { %v1542_v21 = vpop.f32.mrf.mxu3  ;;  %v367_v33 = vsel %vm351_vm5, 1.0, %v1227_v30  ;;  %v970_v61 = vadd.f32 %v1451_v22, %v930_v14 }
 0x194   :  { %v414_v51 = vadd.f32 1.0, %v299_v42  ;;  %v382_v9 = vmul.f32 %v366_v49, %v299_v42  ;;  %v1110_v41 = vpop.eup %1109  ;;  %v743_v63 = vmul.f32 2.0, %v1542_v21 }
 0x195   :  { %v1553_v57 = vpop.trf.xlu1  ;;  %v183_v50 = vpop.f32.mrf.mxu2  ;;  %v445_v47 = vmul.f32 %v1110_v41, %v397_v31  ;;  %v837_v31 = vsel %vm821_vm6, 1.0, %v1227_v30  ;;  %v887_v41 = vadd.f32 1.0, %v1569_v20 }
 0x196   :  { %v1112_v59 = vpop.eup %1111  ;;  %1115 = vrcp.f32 %v414_v51  ;;  %v477_v3 = vadd.f32 %v476_v0, %v382_v9  ;;  %v268_v32 = vmul.f32 2.0, %v183_v50  ;;  %v947_v9 = vadd.f32 %v946_v8, %v852_v55 }
 0x197   :  { %v915_v62 = vmul.f32 %v1112_v59, %v867_v44  ;;  %v461_v1 = vmul.f32 2.0, %v445_v47  ;;  %1117 = vrcp.f32 %v885_v36  ;;  %v1114_v7 = vpop.eup %1113  ;;  %v869_v36 = vsub.f32 1.0, %v837_v31 }
 0x198   :  { %v284_v4 = vsub.f32 %v1502_v46, %v268_v32  ;;  %v916_v46 = vmul.f32 %v1114_v7, %v868_v12  ;;  %v712_v23 = vpop.trf.xlu2  ;;  %1119 = vrcp.f32 %v886_v13  ;;  %v399_v59 = vsub.f32 1.0, %v367_v33  ;;  %v1589_v32 = vld [vmem:[#allocation5 + $0x1] ss:$0 sm:$0xff] }
 0x199   :  { %v336_v5 = vpop.trf.xlu0  ;;  %v501_v58 = vadd.f32 %v500_v29, %v461_v1  ;;  %v931_v16 = vmul.f32 2.0, %v915_v62  ;;  %v757_v29 = vsub.f32 %v725_v2, %v741_v10  ;;  %v726_v47 = vadd.f32 %v1493_v53, %v1268_v34 }
 0x19a   :  { %v300_v0 = vmax.f32 %v284_v4, 0.0  ;;  %vm352_vm7 = vcmp.eq.f32.partialorder %v336_v5, %v1577_v60  ;;  %v932_v51 = vmul.f32 2.0, %v916_v46  ;;  %v853_v62 = vmul.f32 %v837_v31, %v1527_v24 }
 0x19b   :  { %v663_v54 = vpop.f32.mrf.mxu3  ;;  %v971_v43 = vadd.f32 %v970_v61, %v931_v16  ;;  %v1582_v35 = vmax.f32 %v757_v29, 0.0  ;;  %v368_v17 = vsel %vm352_vm7, 1.0, %v1227_v30  ;;  %vm822_vm8 = vcmp.eq.f32.partialorder %v1516_v19, %v1589_v32 }
 0x19c   :  { %v1116_v11 = vpop.eup %1115  ;;  %v415_v49 = vadd.f32 1.0, %v300_v0  ;;  %v383_v26 = vmul.f32 %v367_v33, %v300_v0  ;;  %v728_v53 = vadd.f32 %v712_v23, %v1268_v34  ;;  %v838_v7 = vsel %vm822_vm8, 1.0, %v1227_v30 }
 0x19d   :  { %v446_v25 = vmul.f32 %v1116_v11, %v398_v15  ;;  %v1571_v28 = vpop.trf.xlu1  ;;  %v186_v22 = vpop.f32.mrf.mxu2  ;;  %v744_v15 = vmul.f32 2.0, %v663_v54  ;;  %v1597_v2 = vadd.f32 %v971_v43, %v932_v51  ;;  %v888_v10 = vadd.f32 1.0, %v1582_v35 }
 0x19e   :  { %v269_v42 = vmul.f32 2.0, %v186_v22  ;;  %1121 = vrcp.f32 %v415_v49  ;;  %v478_v40 = vadd.f32 %v477_v3, %v383_v26  ;;  %v1118_v48 = vpop.eup %1117  ;;  %v742_v3 = vmul.f32 2.0, %v1508_v18 }
 0x19f   :  { %v462_v44 = vmul.f32 2.0, %v446_v25  ;;  %v1120_v12 = vpop.eup %1119  ;;  %v917_v24 = vmul.f32 %v1118_v48, %v869_v36  ;;  %1123 = vrcp.f32 %v887_v41  ;;  %v948_v0 = vadd.f32 %v947_v9, %v853_v62 }
 0x1a0   :  { %v285_v37 = vsub.f32 %v1506_v56, %v269_v42  ;;  %v727_v56 = vadd.f32 %v1532_v39, %v1268_v34  ;;  %v758_v39 = vsub.f32 %v726_v47, %v742_v3  ;;  %vm823_vm10 = vcmp.eq.f32.partialorder %v1553_v57, %v1589_v32 }
 0x1a1   :  { %v502_v27 = vadd.f32 %v501_v58, %v462_v44  ;;  %v337_v50 = vpop.trf.xlu0  ;;  %v713_v58 = vpop.trf.xlu2  ;;  %v760_v8 = vsub.f32 %v728_v53, %v744_v15  ;;  %v400_v55 = vsub.f32 1.0, %v368_v17  ;;  %v870_v25 = vsub.f32 1.0, %v838_v7 }
 0x1a2   :  { %v301_v14 = vmax.f32 %v285_v37, 0.0  ;;  %v759_v61 = vsub.f32 %v727_v56, %v743_v63  ;;  %vm353_vm9 = vcmp.eq.f32.partialorder %v337_v50, %v1577_v60  ;;  %v729_v23 = vadd.f32 %v713_v58, %v1268_v34 }
 0x1a3   :  { %v666_v33 = vpop.f32.mrf.mxu3  ;;  %v1611_v19 = vmax.f32 %v758_v39, 0.0  ;;  %v369_v49 = vsel %vm353_vm9, 1.0, %v1227_v30  ;;  %v933_v22 = vmul.f32 2.0, %v917_v24  ;;  %v839_v34 = vsel %vm823_vm10, 1.0, %v1227_v30 }
 0x1a4   :  { %v416_v1 = vadd.f32 1.0, %v301_v14  ;;  %v384_v52 = vmul.f32 %v368_v17, %v301_v14  ;;  %v1122_v18 = vpop.eup %1121  ;;  %v745_v54 = vmul.f32 2.0, %v666_v33  ;;  %v1614_v31 = vmax.f32 %v759_v61, 0.0 }
 0x1a5   :  { %v1600_v4 = vpop.trf.xlu1  ;;  %v189_v5 = vpop.f32.mrf.mxu2  ;;  %v447_v13 = vmul.f32 %v1122_v18, %v399_v59  ;;  %vm824_vm11 = vcmp.eq.f32.partialorder %v1571_v28, %v1589_v32  ;;  %v889_v17 = vadd.f32 1.0, %v1611_v19  ;;  %v871_v50 = vsub.f32 1.0, %v839_v34 }
 0x1a6   :  { %1125 = vrcp.f32 %v416_v1  ;;  %v479_v21 = vadd.f32 %v478_v40, %v384_v52  ;;  %v270_v16 = vmul.f32 2.0, %v189_v5  ;;  %v1124_v26 = vpop.eup %1123  ;;  %v854_v40 = vmul.f32 %v838_v7, %v1555_v45 }
 0x1a7   :  { %v463_v11 = vmul.f32 2.0, %v447_v13  ;;  %1127 = vrcp.f32 %v888_v10  ;;  %v761_v36 = vsub.f32 %v729_v23, %v745_v54  ;;  %v890_v59 = vadd.f32 1.0, %v1614_v31 }
 0x1a8   :  { %v286_v46 = vsub.f32 %v1536_v38, %v270_v16  ;;  %v1623_v38 = vmax.f32 %v760_v8, 0.0  ;;  %v840_v47 = vsel %vm824_vm11, 1.0, %v1227_v30  ;;  %vm825_vm13 = vcmp.eq.f32.partialorder %v1600_v4, %v1589_v32 }
 0x1a9   :  { %v503_v29 = vadd.f32 %v502_v27, %v463_v11  ;;  %v338_v43 = vpop.trf.xlu0  ;;  %v918_v27 = vmul.f32 %v1120_v12, %v870_v25  ;;  %v777_v63 = vmax.f32 %v761_v36, 0.0  ;;  %v401_v1 = vsub.f32 1.0, %v369_v49 }
 0x1aa   :  { %v302_v42 = vmax.f32 %v286_v46, 0.0  ;;  %vm354_vm12 = vcmp.eq.f32.partialorder %v338_v43, %v1577_v60  ;;  %v891_v3 = vadd.f32 1.0, %v1623_v38  ;;  %v949_v28 = vadd.f32 %v948_v0, %v854_v40 }
 0x1ab   :  { %v370_v60 = vsel %vm354_vm12, 1.0, %v1227_v30  ;;  %v855_v53 = vmul.f32 %v839_v34, %v1569_v20  ;;  %v919_v15 = vmul.f32 %v1124_v26, %v871_v50  ;;  %v841_v18 = vsel %vm825_vm13, 1.0, %v1227_v30 }
 0x1ac   :  { %v1126_v44 = vpop.eup %1125  ;;  %v417_v51 = vadd.f32 1.0, %v302_v42  ;;  %v385_v9 = vmul.f32 %v369_v49, %v302_v42  ;;  %v872_v5 = vsub.f32 1.0, %v840_v47  ;;  %v892_v39 = vadd.f32 1.0, %v777_v63 }
 0x1ad   :  { %v448_v48 = vmul.f32 %v1126_v44, %v400_v55  ;;  %v810_v41 = vpop.trf.xlu1  ;;  %v192_v37 = vpop.f32.mrf.mxu2  ;;  %v973_v33 = vadd.f32 %v1597_v2, %v933_v22  ;;  %v934_v7 = vmul.f32 2.0, %v918_v27  ;;  %v950_v16 = vadd.f32 %v949_v28, %v855_v53 }
 0x1ae   :  { %v271_v45 = vmul.f32 2.0, %v192_v37  ;;  %1129 = vrcp.f32 %v417_v51  ;;  %v480_v62 = vadd.f32 %v479_v21, %v385_v9  ;;  %v1128_v56 = vpop.eup %1127  ;;  %vm826_vm14 = vcmp.eq.f32.partialorder %v810_v41, %v1589_v32 }
 0x1af   :  { %v464_v57 = vmul.f32 2.0, %v448_v48  ;;  %1131 = vrcp.f32 %v889_v17  ;;  %v842_v13 = vsel %vm826_vm14, 1.0, %v1227_v30  ;;  %v857_v0 = vmul.f32 %v841_v18, %v1611_v19 }
 0x1b0   :  { %v287_v14 = vsub.f32 %v1540_v6, %v271_v45  ;;  %1133 = vrcp.f32 %v890_v59  ;;  %v856_v6 = vmul.f32 %v840_v47, %v1582_v35  ;;  %v873_v35 = vsub.f32 1.0, %v841_v18 }
 0x1b1   :  { %v504_v12 = vadd.f32 %v503_v29, %v464_v57  ;;  %1135 = vrcp.f32 %v891_v3  ;;  %v920_v46 = vmul.f32 %v1128_v56, %v872_v5  ;;  %v874_v23 = vsub.f32 1.0, %v842_v13 }
 0x1b2   :  { %v303_v52 = vmax.f32 %v287_v14, 0.0  ;;  %v402_v54 = vsub.f32 1.0, %v370_v60  ;;  %v935_v25 = vmul.f32 2.0, %v919_v15  ;;  %v951_v29 = vadd.f32 %v950_v16, %v856_v6 }
 0x1b3   :  { %v858_v49 = vmul.f32 %v842_v13, %v1614_v31  ;;  %v974_v44 = vadd.f32 %v973_v33, %v934_v7  ;;  %v936_v34 = vmul.f32 2.0, %v920_v46 }
 0x1b4   :  { %v418_v24 = vadd.f32 1.0, %v303_v52  ;;  %v386_v10 = vmul.f32 %v370_v60, %v303_v52  ;;  %v1130_v4 = vpop.eup %1129  ;;  %v952_v19 = vadd.f32 %v951_v29, %v857_v0 }
 0x1b5   :  { %v811_v21 = vpop.trf.xlu1  ;;  %v449_v58 = vmul.f32 %v1130_v4, %v401_v1  ;;  %v1132_v61 = vpop.eup %1131  ;;  %v975_v41 = vadd.f32 %v974_v44, %v935_v25  ;;  %v991_v25 = vlaneseq }
 0x1b6   :  { %1137 = vrcp.f32 %v418_v24  ;;  %vm827_vm15 = vcmp.eq.f32.partialorder %v811_v21, %v1589_v32  ;;  %v481_v20 = vadd.f32 %v480_v62, %v386_v10  ;;  %v1134_v55 = vpop.eup %1133  ;;  %v921_v22 = vmul.f32 %v1132_v61, %v873_v35 }
 0x1b7   :  { %v465_v11 = vmul.f32 2.0, %v449_v58  ;;  %v843_v8 = vsel %vm827_vm15, 1.0, %v1227_v30  ;;  %1139 = vrcp.f32 %v892_v39  ;;  %v1136_v26 = vpop.eup %1135  ;;  %v922_v48 = vmul.f32 %v1134_v55, %v874_v23 }
 0x1b8   :  { %482 = vadd.xlane.f32.xlu0 %v481_v20  ;;  %v875_v42 = vsub.f32 1.0, %v843_v8  ;;  %v859_v40 = vmul.f32 %v843_v8, %v1623_v38  ;;  %v953_v37 = vadd.f32 %v952_v19, %v858_v49  ;;  %v937_v27 = vmul.f32 2.0, %v921_v22 }
 0x1b9   :  { %v505_v2 = vadd.f32 %v504_v12, %v465_v11  ;;  %v976_v47 = vadd.f32 %v975_v41, %v936_v34  ;;  %v938_v3 = vmul.f32 2.0, %v922_v48  ;;  %v992_v29 = vand.u32 127, %v991_v25 }
 0x1ba   :  { %v923_v31 = vmul.f32 %v1136_v26, %v875_v42  ;;  %v954_v59 = vadd.f32 %v953_v37, %v859_v40 }
 0x1bb   :  { %v977_v56 = vadd.f32 %v976_v47, %v937_v27  ;;  %vm993_vm1 = vcmp.eq.s32.totalorder %v992_v29, 0  ;;  %vm996_vm2 = vcmp.eq.s32.totalorder %v992_v29, 1 }
 0x1bc   :  { %v1138_v43 = vpop.eup %1137  ;;  %v939_v60 = vmul.f32 2.0, %v923_v31 }
 0x1bd   :  { %v812_v51 = vpop.trf.xlu1  ;;  %v450_v9 = vmul.f32 %v1138_v43, %v402_v54  ;;  %v1140_v36 = vpop.eup %1139 }
 0x1be   :  { %vm828_vm0 = vcmp.eq.f32.partialorder %v812_v51, %v1589_v32  ;;  %v978_v32 = vadd.f32 %v977_v56, %v938_v3 }
 0x1bf   :  { %v844_v17 = vsel %vm828_vm0, 1.0, %v1227_v30  ;;  %v466_v45 = vmul.f32 2.0, %v450_v9 }
 0x1c0   :  { %v860_v50 = vmul.f32 %v844_v17, %v777_v63  ;;  %v876_v57 = vsub.f32 1.0, %v844_v17  ;;  %v979_v1 = vadd.f32 %v978_v32, %v939_v60 }
 0x1c1   :  { %v506_v38 = vadd.f32 %v505_v2, %v466_v45 }
 0x1c2   :  { %v955_v14 = vadd.f32 %v954_v59, %v860_v50  ;;  %v924_v62 = vmul.f32 %v1140_v36, %v876_v57 }
 0x1c3   :  { %507 = vadd.xlane.f32.xlu1 %v506_v38 }
 0x1c4   :  { %956 = vadd.xlane.f32.xlu2 %v955_v14  ;;  %v940_v12 = vmul.f32 2.0, %v924_v62 }
 0x1c6   :  { %v980_v52 = vadd.f32 %v979_v1, %v940_v12 }
 0x1cb   :  { %981 = vadd.xlane.f32.xlu1 %v980_v52 }
 0x22b   :  { %v483_v28 = vpop.xlane.xlu0 %482 }
 0x22c   :  { %v484_v30 = vrot.slane %v483_v28, 4 }
 0x22e   :  { %v485_v53 = vadd.f32 %v484_v30, %v483_v28 }
 0x230   :  { %v486_v63 = vrot.slane %v485_v53, 2 }
 0x232   :  { %v487_v15 = vadd.f32 %v486_v63, %v485_v53 }
 0x234   :  { %v488_v6 = vrot.slane %v487_v15, 1 }
 0x236   :  { %v508_v18 = vpop.xlane.xlu1 %507  ;;  %v489_v24 = vadd.f32 %v488_v6, %v487_v15 }
 0x237   :  { %v509_v10 = vrot.slane %v508_v18, 4  ;;  %v957_v4 = vpop.xlane.xlu2 %956 }
 0x238   :  { %v958_v5 = vrot.slane %v957_v4, 4  ;;  %1059 = vpush %v489_v24 }
 0x239   :  { %v510_v13 = vadd.f32 %v509_v10, %v508_v18 }
 0x23a   :  { %v959_v39 = vadd.f32 %v958_v5, %v957_v4 }
 0x23b   :  { %v511_v21 = vrot.slane %v510_v13, 2 }
 0x23c   :  { %v960_v58 = vrot.slane %v959_v39, 2 }
 0x23d   :  { %v512_v20 = vadd.f32 %v511_v21, %v510_v13 }
 0x23e   :  { %v961_v33 = vadd.f32 %v960_v58, %v959_v39  ;;  %v982_v7 = vpop.xlane.xlu1 %981 }
 0x23f   :  { %v983_v35 = vrot.slane %v982_v7, 4  ;;  %v513_v61 = vrot.slane %v512_v20, 1 }
 0x240   :  { %v962_v16 = vrot.slane %v961_v33, 1 }
 0x241   :  { %v984_v0 = vadd.f32 %v983_v35, %v982_v7  ;;  %v514_v11 = vadd.f32 %v513_v61, %v512_v20 }
 0x242   :  { %v963_v8 = vadd.f32 %v962_v16, %v961_v33 }
 0x243   :  { %v985_v55 = vrot.slane %v984_v0, 2  ;;  %1061 = vpush %v514_v11 }
 0x244   :  { %1063 = vpush %v963_v8 }
 0x245   :  { %v986_v46 = vadd.f32 %v985_v55, %v984_v0 }
 0x247   :  { %v987_v23 = vrot.slane %v986_v46, 1 }
 0x249   :  { %v988_v54 = vadd.f32 %v987_v23, %v986_v46 }
 0x24b   :  { %1065 = vpush %v988_v54 }
 0x269   :  { %s1060_s0 = spop %1059 }
 0x274   :  { %s1062_s1 = spop %1061 }
 0x275   :  { %s1064_s23 = spop %1063 }
 0x276   :  { %s965_s24 = sadd.f32 %s1064_s23, %s1060_s0 }
 0x278   :  { %v994_v49 = vstv %s965_s24 }
 0x279   :  { %v995_v26 = vsel %vm993_vm1, %v994_v49, 0.0 }
 0x27c   :  { %s1066_s25 = spop %1065 }
 0x27d   :  { %s990_s26 = sadd.f32 %s1066_s25, %s1062_s1 }
 0x27f   :  { %v997_v2 = vstv %s990_s26 }
 0x280   :  { %v998_v22 = vsel %vm996_vm2, %v997_v2, 0.0 }
 0x281   :  { %v999_v42 = vadd.f32 %v998_v22, %v995_v26 }
 0x283   :  { %1000 = vst [vmem:[#allocation7] sm:$0xff] %v999_v42 }
 0x284   :  { %1011 = dma.vmem_to_hbm [thread:$0]  %s1007_s28, 128, %s1009_s3, [#allocation4]  }
 0x285   :  { %1219 = dma.done.wait [#allocation4], 128  }
 0x286   :  { %1220 = vsyncadd [#allocation4], 4294967168 }
 0x287   :  { %1016 = vsyncpa [#allocation3], 1 }
 0x288   :  { %1017 = vsyncpa [#allocation6], 1 }
 0x289   :  { %1018 = vsyncpa [#allocation4], 1 }

</bundles_post_ra>
